<compile_context>
chip_gen: v6e
topology: v6e:2x2x1
jax: 0.10.0
libtpu: 0.0.40
codegen_flags: <defaults>
</compile_context>

<pallas_src>
import functools

import jax
import jax.numpy as jnp
from jax import lax
from jax.experimental import pallas as pl
from jax.experimental.pallas import tpu as pltpu

_EA_EPS = 1e-10  # eps used inside pytorch3d's EmissionAbsorptionRaymarcher


def _round_up(x, m):
    return (x + m - 1) // m * m


def _spatial_tiling(hw, depth):
    """Pick a lane-dense spatial tile T (multiple of 128) and the padded spatial extent."""
    hw_pad = _round_up(hw, 128)
    # Keep a full (depth, T) f32 block comfortably small for in-register reduction.
    max_elems = 32 * 1024
    t = min(hw_pad, 2048, max(128, (max_elems // max(depth, 1)) // 128 * 128))
    hw_pad = _round_up(hw_pad, t)
    return hw_pad, t, hw_pad // t


def _const_density_kernel(gray_const, w_ref, feat_ref, out_ref):
    """Constant-density path: gray = sum_i (0.75*s*(1+eps-s)^i) * f_i + 0.25*(1-(1-s)^D)."""
    f = feat_ref[...].astype(jnp.float32)                       # (D, T)
    acc = jnp.sum(f * w_ref[...], axis=0, keepdims=True)        # (1, T) weighted sum over depth
    out_ref[...] = acc + gray_const


def _varying_density_kernel(scale, depth, unroll, feat_ref, dens_ref, out_ref):
    """General path: full-depth front-to-back compositing carried in registers."""
    t = out_ref.shape[-1]

    def body(i, carry):
        acc, trans, rem = carry
        f = feat_ref[pl.ds(i, 1), :].astype(jnp.float32)        # (1, T)
        d = dens_ref[pl.ds(i, 1), :].astype(jnp.float32) * scale
        acc = acc + d * trans * f
        trans = trans * ((1.0 + _EA_EPS) - d)
        rem = rem * (1.0 - d)
        return acc, trans, rem

    init = (jnp.zeros((1, t), jnp.float32),
            jnp.ones((1, t), jnp.float32),
            jnp.ones((1, t), jnp.float32))
    acc, _, rem = lax.fori_loop(0, depth, body, init, unroll=unroll)
    out_ref[...] = (3.0 * acc + (1.0 - rem)) * 0.25


def xray_volume_render(image3d, opacity=None, norm_type="minimized",
                       scaling_factor=0.1, is_grayscale=True):
    """image3d: (B, C, D, H, W). Returns (B, 1, W, H) like the PyTorch module (grayscale)."""
    assert is_grayscale, "only the is_grayscale=True path is implemented"
    B, C, D, H, W = image3d.shape
    HW = H * W

    # Grayscale compositing is linear in the feature channels -> fold the channel mean up front.
    feat = image3d[:, 0] if C == 1 else jnp.mean(image3d, axis=1)       # (B, D, H, W)
    if not jnp.issubdtype(feat.dtype, jnp.floating):
        feat = feat.astype(jnp.float32)
    feat = feat.reshape(B, D, HW)                                        # lane-dense spatial axis

    HWp, T, n_tiles = _spatial_tiling(HW, D)
    if HWp != HW:
        feat = jnp.pad(feat, ((0, 0), (0, 0), (0, HWp - HW)))

    out_shape = jax.ShapeDtypeStruct((B, 1, HWp), jnp.float32)
    feat_spec = pl.BlockSpec((None, D, T), lambda b, t: (b, 0, t))
    out_spec = pl.BlockSpec((None, 1, T), lambda b, t: (b, 0, t))
    cparams = pltpu.CompilerParams(dimension_semantics=("parallel", "parallel"))

    s = float(scaling_factor)
    if opacity is None:
        # densities == scaling_factor everywhere: closed-form weights, density never streamed.
        decay = jnp.full((D,), (1.0 + _EA_EPS) - s, jnp.float32)
        trans = jnp.cumprod(decay)
        trans_excl = jnp.concatenate([jnp.ones((1,), jnp.float32), trans[:-1]])
        weights = ((0.75 * s) * trans_excl).reshape(D, 1).astype(jnp.float32)
        gray_const = 0.25 * (1.0 - (1.0 - s) ** D)               # 0.25 * final opacity

        proj = pl.pallas_call(
            functools.partial(_const_density_kernel, gray_const),
            out_shape=out_shape,
            grid_spec=pltpu.PrefetchScalarGridSpec(
                num_scalar_prefetch=0,
                grid=(B, n_tiles),
                in_specs=[
                    pl.BlockSpec((D, 1), lambda b, t: (0, 0)),   # tiny resident weight vector
                    feat_spec,
                ],
                out_specs=out_spec,
            ),
            compiler_params=cparams,
        )(weights, feat)
    else:
        # densities = opacity * scaling_factor (opacity is single-channel, like the module).
        dens = opacity[:, 0]
        if not jnp.issubdtype(dens.dtype, jnp.floating):
            dens = dens.astype(jnp.float32)
        dens = dens.reshape(B, D, HW)
        if HWp != HW:
            dens = jnp.pad(dens, ((0, 0), (0, 0), (0, HWp - HW)))
        unroll = True if D <= 32 else 8

        proj = pl.pallas_call(
            functools.partial(_varying_density_kernel, s, D, unroll),
            out_shape=out_shape,
            grid_spec=pltpu.PrefetchScalarGridSpec(
                num_scalar_prefetch=0,
                grid=(B, n_tiles),
                in_specs=[feat_spec, feat_spec],
                out_specs=out_spec,
            ),
            compiler_params=cparams,
        )(feat, dens)

    # screen_RGBA.permute(0, 3, 2, 1) -> (B, 4, W, H); channel mean (keepdim) -> (B, 1, W, H)
    proj = proj[:, 0, :HW].reshape(B, H, W)
    screen = jnp.transpose(proj, (0, 2, 1))[:, None]

    eps = 1e-8
    if norm_type == "minimized":
        screen = (screen + eps) / (jnp.max(screen) + eps)
    elif norm_type == "normalized":
        screen = (screen - jnp.min(screen) + eps) / (jnp.max(screen) - jnp.min(screen) + eps)
    elif norm_type == "standardized":
        std = (screen - jnp.mean(screen)) / (jnp.std(screen, ddof=1) + eps)
        screen = (std - jnp.min(std) + eps) / (jnp.max(std) - jnp.min(std) + eps)
    return screen


def _reference(feat, dens):
    """Plain-JAX reference of the sequential emission-absorption math (minimized norm)."""
    trans = jnp.cumprod((1.0 + _EA_EPS) - dens, axis=1)
    trans = jnp.concatenate([jnp.ones_like(trans[:, :1]), trans[:, :-1]], axis=1)
    acc = jnp.sum(dens * trans * feat, axis=1)                   # (B, H, W)
    opac = 1.0 - jnp.prod(1.0 - dens, axis=1)
    gray = (3.0 * acc + opac) * 0.25
    screen = jnp.transpose(gray, (0, 2, 1))[:, None]
    return (screen + 1e-8) / (jnp.max(screen) + 1e-8)


if __name__ == "__main__":
    key = jax.random.PRNGKey(0)
    k1, k2 = jax.random.split(key)
    B, C, D, H, W = 2, 1, 16, 16, 16                 # small shapes; n_pts_per_ray == D
    image3d = jax.random.uniform(k1, (B, C, D, H, W), dtype=jnp.float32)

    # Path 1: opacity=None (constant density, the module's default usage).
    out = xray_volume_render(image3d, opacity=None, norm_type="minimized",
                             scaling_factor=0.1, is_grayscale=True)
    out = jax.block_until_ready(out)
    ref = _reference(image3d[:, 0].astype(jnp.float32),
                     jnp.full((B, D, H, W), 0.1, jnp.float32))
    assert out.shape == (B, 1, W, H)
    assert jnp.allclose(out, ref, atol=1e-5, rtol=1e-5)

    # Path 2: user-provided opacity volume.
    opacity = jax.random.uniform(k2, (B, 1, D, H, W), dtype=jnp.float32)
    out2 = xray_volume_render(image3d, opacity=opacity, norm_type="minimized",
                              scaling_factor=0.1, is_grayscale=True)
    out2 = jax.block_until_ready(out2)
    ref2 = _reference(image3d[:, 0].astype(jnp.float32), opacity[:, 0] * 0.1)
    assert out2.shape == (B, 1, W, H)
    assert jnp.allclose(out2, ref2, atol=1e-5, rtol=1e-5)

    print("KERNEL_OK")
</pallas_src>

<mosaic_0001>
module attributes {stable_mosaic.version = 11 : i64} {
  func.func @_const_density_kernel(%arg0: i32, %arg1: i32, %arg2: memref<16x1xf32, #tpu.memory_space<vmem>>, %arg3: memref<1x16x256xf32, #tpu.memory_space<vmem>>, %arg4: memref<1x1x256xf32, #tpu.memory_space<vmem>>) attributes {dimension_semantics = [#tpu.dimension_semantics<parallel>, #tpu.dimension_semantics<parallel>], iteration_bounds = array<i64: 2, 1>, scalar_prefetch = 0 : i64, scratch_operands = 0 : i64, tpu.core_type = #tpu.core_type<tc>, window_params = [{pipeline_mode = #tpu.pipeline_mode<synchronous>, transform_indices = @transform_0, window_bounds = array<i64: 16, 1>}, {transform_indices = @transform_1, window_bounds = array<i64: 1, 16, 256>}, {transform_indices = @transform_2, window_bounds = array<i64: 1, 1, 256>}]} {
    %c0 = arith.constant 0 : index
    %c0_0 = arith.constant 0 : index
    %c0_1 = arith.constant 0 : index
    %0 = vector.load %arg3[%c0, %c0_0, %c0_1] : memref<1x16x256xf32, #tpu.memory_space<vmem>>, vector<1x16x256xf32>
    %1 = vector.shape_cast %0 : vector<1x16x256xf32> to vector<16x256xf32>
    %c0_2 = arith.constant 0 : index
    %c0_3 = arith.constant 0 : index
    %2 = vector.load %arg2[%c0_2, %c0_3] : memref<16x1xf32, #tpu.memory_space<vmem>>, vector<16x1xf32>
    %3 = vector.broadcast %2 : vector<16x1xf32> to vector<16x256xf32>
    %4 = arith.mulf %1, %3 : vector<16x256xf32>
    %cst = arith.constant dense<0.000000e+00> : vector<256xf32>
    %5 = vector.multi_reduction <add>, %4, %cst [0] : vector<16x256xf32> to vector<256xf32>
    %6 = vector.shape_cast %5 : vector<256xf32> to vector<1x256xf32>
    %cst_4 = arith.constant 0.203674495 : f32
    %7 = vector.broadcast %cst_4 : f32 to vector<1x256xf32>
    %8 = arith.addf %6, %7 : vector<1x256xf32>
    %c0_5 = arith.constant 0 : index
    %c0_6 = arith.constant 0 : index
    %c0_7 = arith.constant 0 : index
    %9 = vector.load %arg4[%c0_5, %c0_6, %c0_7] : memref<1x1x256xf32, #tpu.memory_space<vmem>>, vector<1x1x256xf32>
    %10 = vector.shape_cast %9 : vector<1x1x256xf32> to vector<1x256xf32>
    %11 = vector.shape_cast %8 : vector<1x256xf32> to vector<1x1x256xf32>
    tpu.vector_store %arg4[%c0_5, %c0_6, %c0_7], %11 {strides = array<i32>} : memref<1x1x256xf32, #tpu.memory_space<vmem>>, vector<1x1x256xf32>,
    return
  }
  func.func @transform_0(%arg0: i32, %arg1: i32) -> (i32, i32) {
    %c0_i32 = arith.constant 0 : i32
    %c0_i32_0 = arith.constant 0 : i32
    %c0_i32_1 = arith.constant 0 : i32
    return %c0_i32, %c0_i32_0 : i32, i32
  }
  func.func @transform_1(%arg0: i32, %arg1: i32) -> (i32, i32, i32) {
    %c0_i32 = arith.constant 0 : i32
    %c0_i32_0 = arith.constant 0 : i32
    return %arg0, %c0_i32, %arg1 : i32, i32, i32
  }
  func.func @transform_2(%arg0: i32, %arg1: i32) -> (i32, i32, i32) {
    %c0_i32 = arith.constant 0 : i32
    %c0_i32_0 = arith.constant 0 : i32
    return %arg0, %c0_i32, %arg1 : i32, i32, i32
  }
}

</mosaic_0001>

<bundles_post_ra>
// kernel: tpu_custom_call.1
= control target key start
LH: loop header
LB: loop body
LE: loop exit
PB: predicated region body
PF: predicated region fallthrough
CT: control target
= control target key end

     0   :  { %7 = vsyncpa [#allocation3], 0  ;;  %s696_s0 = inlined_call_operand.vmem [shape: f32[16,1], index: 0, kind: input, shape index: {}]   ;;  %s697_s1 = inlined_call_operand.hbm [shape: f32[2,16,256], index: 1, kind: input, shape index: {}]   ;;  %s698_s2 = inlined_call_operand.hbm [shape: f32[2,1,256], index: 2, kind: output, shape index: {}]  }
   0x1   :  { %9 = vsyncpa [#allocation3 + $0x1], 0 }
   0x2   :  { %10 = vsyncpa [#allocation4], 0 }
   0x3   :  { %12 = vsyncpa [#allocation4 + $0x1], 0  ;;  %s557_s9 = smov 0   ;;  %s559_s10 = smov 0  }
   0x4   :  { %s561_s11 = smov 0   ;;  %s563_s12 = smov 0  }
   0x5   :  { %s565_s13 = smov 0   ;;  %s567_s14 = smov 0  }
   0x6 LB: > { %s342_s15 = sadd.s32 4294967295, %s534_s14   ;;  %s343_s16 = sadd.s32 4294967294, %s534_s14   ;;  %s534_s14 = sphi %s567_s14, %s18_s14   ;;  %s530_s13 = sphi %s565_s13, %s709_s13   ;;  %s526_s12 = sphi %s563_s12, %s708_s12   ;;  %s522_s11 = sphi %s561_s11, %s707_s11   ;;  %s518_s10 = sphi %s559_s10, %s706_s10   ;;  %s514_s9 = sphi %s557_s9, %s705_s9  }
   0x7   : > { %s30_s17 = sadd.s32 1, %s530_s13  ;;  %s60_s18 = sadd.s32 1, %s522_s11 }
   0x8   : > { %p32_p0 = scmp.ge.s32.totalorder %s30_s17, 2  ;;  %p67_p1 = scmp.ne.s32.totalorder %s522_s11, %s518_s10 }
   0x9   : > { %p68_p2 = scmp.eq.s32.totalorder %s534_s14, 0  ;;  %p73_p3 = scmp.ne.s32.totalorder %s518_s10, %s514_s9 }
   0xa   : > { %s711_s17 = smov (%p32_p0, %s30_s17), 0  ;;  %p74_p5 = scmp.eq.s32.totalorder %s342_s15, 0 }
   0xb   : > { %p598_p4 = por %p68_p2, %p67_p1  ;;  %s55_s20 = ssub.s32 %s530_s13, %s711_s17 }
   0xc   : > { %p99_p6 = scmp.eq.s32.totalorder %s342_s15, 1  ;;  %p58_p7 = scmp.eq.s32.totalorder %s55_s20, 0 }
   0xd   : > { %p604_p8 = por %p74_p5, %p73_p3  ;;  %p105_p10 = scmp.eq.s32.totalorder %s343_s16, 1 }
   0xe   : > { %p608_p9 = por %p99_p6, %p67_p1  ;;  %p371_p13 = scmp.lt.s32.totalorder %s534_s14, 2 }
   0xf   : > { %s613_s23 = scalar_select %p58_p7, %s522_s11, %s60_s18  }
  0x10   : > { %p615_p11 = por %p105_p10, %p73_p3  ;;  %s128_s25 = sand.u32 1, %s522_s11  }
  0x11   : > { %s346_s26 = sshll.u32 %s128_s25, 5  ;;  %s357_s27 = sshll.u32 %s530_s13, 9 }
  0x12   : > { %s140_s30 = scalar_lea.hbm %s697_s1, %s357_s27  ;;  %s132_s3 = scalar_lea.vmem [#allocation2], %s346_s26 }
  0x13   : > { %s141_s4 = sshll.u32 %s132_s3, 4  ;;  %p628_p0 = pnand %p371_p13, %p598_p4  ;;  %s142_s4 = int_to_ptr.vmem [resolvable:$true] %s141_s4 }
  0x14   : > { %p349_p1 = scmp.ge.s32.totalorder %s534_s14, 1  ;;  %s129_s6 = scalar_lea.sflag [#allocation3], %s128_s25 }
  0x15   : > { %p428_p2 = pneg %p628_p0  ;;  %s439_s7 = scalar_lea.vmem %s142_s4, 512 }
  0x16   : > { %p440_p3 = scmp.ne.s32.totalorder %s142_s4, %s439_s7  ;;  %s536_s8 = smov [#allocation2]  }
  0x17   : > { %s444_s15 = sshll.u32 %s536_s8, 4  ;;  %s445_s15 = int_to_ptr.vmem [resolvable:$false] %s444_s15 }
  0x18   : > { %p442_p5 = pnand %p440_p3, %p428_p2  ;;  %s446_s16 = scalar_lea.vmem %s445_s15, 1024 }
  0x19   : > { %p447_p7 = scmp.lt.s32.totalorder %s142_s4, %s445_s15  ;;  %p448_p10 = scmp.lt.s32.totalorder %s446_s16, %s439_s7 }
  0x1a   : > { %p443_p6 = pneg %p442_p5 }
  0x1b   : > { %p449_p12 = por %p448_p10, %p447_p7 }
  0x1d   : > { %p450_p4 = pnand %p449_p12, %p443_p6 }
  0x1f   : > { %453 = shalt.err (!%p450_p4)
}
  0x20   : > { %s537_s18 = smov 256   ;;  %s538_s19 = smov 16  }
  0x21   : > { %366 = dma.hbm_to_vmem [thread:$0]  (!%p628_p0), %s140_s30, 512, %s142_s4, %s129_s6, %s537_s18, %s537_s18, %s538_s19  }
  0x22   : > { %p149_p13 = scmp.lt.s32.totalorder %s534_s14, 3 }
  0x24   : > { %p150_p2 = pnand %p349_p1, %p149_p13 }
  0x25   : > { %s641_s20 = sand.u32 (!%p150_p2), 1, %s518_s10  }
  0x26   : > { %153 = sbr.rel (%p150_p2) target bundleno = 211 (0xd3), region = 28  ;;  %s350_s25 = sshll.u32 (!%p150_p2), %s641_s20, 5 }
  0x27   : > { %s156_s26 = scalar_lea.sflag (!%p150_p2), [#allocation3], %s641_s20  ;;  %s159_s27 = scalar_lea.vmem (!%p150_p2), [#allocation2], %s350_s25 }
  0x2b   : > { %505 = dma.done.wait (%p604_p8), %s156_s26, 512  }
  0x2c   : > { %507 = vsyncadd (%p604_p8), %s156_s26, 4294966784  ;;  %v539_v0 = vmov 0   ;;  %v186_v1 = vld [vmem:[%s696_s0] sm:$0xff]  ;;  %v187_v2 = vld [vmem:[%s696_s0 + $0x8] sm:$0xff]  ;;  %v540_v21 = vmov 1966171168   ;;  %v224_v23 = vlaneseq }
  0x2d   : > { %425 = vset.pattern.permute.xlu0 %v539_v0  ;;  %v182_v4 = vld [vmem:[%s159_s27] sm:$0xff]  ;;  %v183_v5 = vld [vmem:[%s159_s27 + $0x8] sm:$0xff]  ;;  %v184_v6 = vld [vmem:[%s159_s27 + $0x10] sm:$0xff]  ;;  %v222_v22 = vunpack.c.l.s4 %v540_v21  ;;  %s351_s21 = sshll.u32 %s641_s20, 1  ;;  %s358_s4 = sshll.u32 %s526_s12, 5 }
  0x2e   : > { %190 = vperm.xlu0 %425, %v186_v1   ;;  %v185_v7 = vld [vmem:[%s159_s27 + $0x18] sm:$0xff]  ;;  %v225_v29 = vshrl.u32 %v224_v23, 7  ;;  %s179_s5 = scalar_lea.vmem [#allocation5], %s351_s21  ;;  %vm238_vm0 = vcmp.lt.s32.totalorder %v224_v23, 256  ;;  %s256_s15 = scalar_lea.hbm %s698_s2, %s358_s4 }
  0x2f   : > { %v223_v28 = vunpack.c.0.s8 %v222_v22  ;;  %s258_s6 = sshll.u32 %s179_s5, 4  ;;  %s242_s16 = scalar_lea.sflag [#allocation4], %s641_s20  ;;  %s259_s6 = int_to_ptr.vmem [resolvable:$true] %s258_s6 }
  0x30   : > { %s454_s18 = scalar_lea.vmem %s259_s6, 32  ;;  %s541_s19 = smov [#allocation5]  }
  0x31   : > { %v226_v34 = vsub.s32 %v223_v28, %v225_v29  ;;  %p455_p8 = scmp.ne.s32.totalorder %s259_s6, %s454_s18  ;;  %s458_s25 = sshll.u32 %s541_s19, 4  ;;  %s459_s25 = int_to_ptr.vmem [resolvable:$false] %s458_s25 }
  0x32   : > { %195 = vperm.xlu0 %425, %v187_v2   ;;  %s460_s12 = scalar_lea.vmem %s459_s25, 64  ;;  %p461_p1 = scmp.lt.s32.totalorder %s259_s6, %s459_s25 }
  0x33   : > { %p456_p12 = pnand %p455_p8, %p608_p9  ;;  %p462_p3 = scmp.lt.s32.totalorder %s460_s12, %s454_s18 }
  0x35   : > { %p457_p0 = pneg %p456_p12  ;;  %p463_p5 = por %p462_p3, %p461_p1 }
  0x37   : > { %p464_p6 = pnand %p463_p5, %p457_p0 }
  0xa9   : > { %v191_v3 = vpop.permute.xlu0 %190 }
  0xaa   : > { %v198_v9 = vmul.f32 %v191_v3, %v182_v4  ;;  %v199_v10 = vmul.f32 %v191_v3, %v183_v5 }
  0xad   : > { %v196_v8 = vpop.permute.xlu0 %195 }
  0xae   : > { %v200_v11 = vmul.f32 %v196_v8, %v184_v6  ;;  %v201_v12 = vmul.f32 %v196_v8, %v185_v7 }
  0xb0   : > { %v202_v13 = vadd.f32 %v200_v11, %v198_v9  ;;  %v209_v14 = vadd.f32 %v201_v12, %v199_v10 }
  0xb2   : > { %v203_v15 = vrot.slane %v202_v13, 4  ;;  %v210_v16 = vrot.slane %v209_v14, 4 }
  0xb4   : > { %v204_v17 = vadd.f32 %v203_v15, %v202_v13  ;;  %v211_v18 = vadd.f32 %v210_v16, %v209_v14 }
  0xb6   : > { %v205_v19 = vrot.slane %v204_v17, 2  ;;  %v212_v20 = vrot.slane %v211_v18, 2 }
  0xb8   : > { %v206_v24 = vadd.f32 %v205_v19, %v204_v17  ;;  %v213_v25 = vadd.f32 %v212_v20, %v211_v18 }
  0xba   : > { %v207_v26 = vrot.slane %v206_v24, 1  ;;  %v214_v27 = vrot.slane %v213_v25, 1 }
  0xbc   : > { %v208_v30 = vadd.f32 %v207_v26, %v206_v24  ;;  %v215_v31 = vadd.f32 %v214_v27, %v213_v25 }
  0xbe   : > { %v216_v32 = vadd.f32 0.2036745, %v208_v30  ;;  %v217_v33 = vadd.f32 0.2036745, %v215_v31 }
  0xc0   : > { %v220_v35 = vcombine.low %v216_v32, %v217_v33 }
  0xc2   : > { %v227_v36 = vrot.slane %v220_v35, %v226_v34 }
  0xc4   : > { %v234_v37 = vrot.slane %v227_v36, %v226_v34 }
  0xc6   : > { %240 = vst.msk [vmem:[%s179_s5] sm:$0x3] %vm238_vm0, %v234_v37 }
  0xc7   : > { %467 = shalt.err (!%p464_p6)
}
  0xc8   : > { %s468_s26 = scalar_lea.hbm %s256_s15, 32  ;;  %s472_s28 = scalar_lea.hbm %s698_s2, 64 }
  0xc9   : > { %p469_p7 = scmp.ne.s32.totalorder %s256_s15, %s468_s26  ;;  %p473_p13 = scmp.lt.s32.totalorder %s256_s15, %s698_s2 }
  0xca   : > { %p474_p2 = scmp.lt.s32.totalorder %s472_s28, %s468_s26 }
  0xcb   : > { %p470_p10 = pnand %p469_p7, %p608_p9 }
  0xcc   : > { %p475_p8 = por %p474_p2, %p473_p13 }
  0xcd   : > { %p471_p4 = pneg %p470_p10 }
  0xcf   : > { %p476_p12 = pnand %p475_p8, %p471_p4 }
  0xd1   : > { %479 = shalt.err (!%p476_p12)
}
  0xd2   : > { %361 = dma.vmem_to_hbm [thread:$0]  (%p608_p9), %s259_s6, 32, %s256_s15, %s242_s16  }
  0xd3 PF: > { %s270_s3 = sand.u32 1, %s514_s9   ;;  %p704_p0 = scmp.ge.s32.totalorder %s534_s14, 2 }
  0xd4   : > { %s271_s21 = scalar_lea.sflag [#allocation4], %s270_s3 }
  0xd5   : > { %p368_p1 = pnand %p704_p0, %p615_p11 }
  0xd7   : > { %p369_p3 = pneg %p368_p1 }
  0xd9   : > { %509 = dma.done.wait (%p369_p3), %s271_s21, 32  }
  0xda   : > { %511 = vsyncadd (%p369_p3), %s271_s21, 4294967264  ;;  %s18_s14 = sadd.s32 1, %s534_s14   ;;  %s705_s9 = smov %s518_s10 }
  0xdb   : > { %p15_p5 = scmp.ge.s32.totalorder %s18_s14, 4   ;;  %s706_s10 = smov %s522_s11 }
  0xdc   : > { %s707_s11 = smov %s613_s23  ;;  %s708_s12 = smov %s530_s13 }
  0xdd   : > { %s709_s13 = smov %s711_s17  ;;  %17 = sbr.rel (!%p15_p5) target bundleno = 6 (0x6), region = 73 }
  0xe2   :  { %276 = vsyncpa [#allocation3], 1 }
  0xe3   :  { %278 = vsyncpa [#allocation3 + $0x1], 1 }
  0xe4   :  { %279 = vsyncpa [#allocation4], 1 }
  0xe5   :  { %281 = vsyncpa [#allocation4 + $0x1], 1 }

</bundles_post_ra>
